<compile_context>
chip_gen: v7x
topology: tpu7x:2x2x1
jax: 0.10.0
libtpu: 0.0.40
codegen_flags: <defaults>
</compile_context>

<pallas_src>
import functools

import jax
import jax.numpy as jnp
from jax import lax
from jax.experimental import pallas as pl
from jax.experimental.pallas import tpu as pltpu

_LANES = 128        # padded conv1-patch lane count (81 taps + bias-1 + zeros)
_ONES_LANE = 81     # lane holding constant 1.0 (conv1 bias folding)
_C1, _C2, _C3 = 32, 64, 16
_HID = 9 * _C1      # 288: conv1 activations for all 9 conv2 taps, lane-packed
_OUT_PAD = 128      # conv3 output channels padded 16 -> 128 (lane-dense store)


def _round_up(x, m):
    return (x + m - 1) // m * m


def _fused_encoding_cnn_kernel(p_ref, w1_ref, w2_ref, b2_ref, w3_ref, b3_ref,
                               o_ref, *, tb):
    """conv1+ReLU -> conv2+ReLU -> conv3 -> (1,1) avg-pool for one batch tile.

    p_ref : (9*tb, 128)   rows = (conv2-out-pos kidx2, sample b); lanes =
                          (conv2-tap kidx1)*9 + (conv1-tap k); lane 81 == 1.0
    w1_ref: (128, 288)    block-diagonal conv1 weight, row 81 = tiled conv1 bias
    w2_ref: (288, 64)     conv2 weight, (tap, cin) flattened to 288
    b2_ref: (1, 64)       conv2 bias (f32)
    w3_ref: (9, 64, 128)  conv3 weight per spatial tap, cout zero-padded to 128
    b3_ref: (1, 128)      conv3 bias, zero-padded
    o_ref : (tb, 128)     per-sample features (only [:, :16] meaningful)
    """
    # conv1 (+ bias via the ones-lane) and ReLU: one lane-dense MXU pass.
    a1 = jnp.dot(p_ref[...], w1_ref[...], preferred_element_type=jnp.float32)
    a1 = jnp.maximum(a1, 0.0)                                    # (9*tb, 288) f32

    # conv2 + bias + ReLU: a single K=288 matmul.
    a2 = jnp.dot(a1.astype(w2_ref.dtype), w2_ref[...],
                 preferred_element_type=jnp.float32)
    a2 = jnp.maximum(a2 + b2_ref[...], 0.0)                      # (9*tb, 64) f32
    a2 = a2.astype(w3_ref.dtype)

    # conv3 (3x3 input, k3, s3 -> 1x1 output): rows are kidx2-major, so the 9
    # spatial taps are aligned (tb, 64) sublane slices; start from the bias.
    acc = jnp.broadcast_to(b3_ref[...], (tb, _OUT_PAD)).astype(jnp.float32)
    for k2 in range(9):                                          # static unroll
        acc = acc + jnp.dot(a2[k2 * tb:(k2 + 1) * tb, :], w3_ref[k2],
                            preferred_element_type=jnp.float32)

    # AdaptiveAvgPool2d((1,1)) over a 1x1 spatial map + squeeze == identity.
    o_ref[...] = acc.astype(o_ref.dtype)


def _pick_block_b(B):
    b8 = _round_up(B, 8)
    if b8 <= 16:
        return b8
    # Keep >= 2 grid steps when the batch allows so the "parallel" batch axis
    # can shard across v7x's two TensorCores; cap at 512 so the double-buffered
    # patch stream plus the (9*tb, 288) f32 intermediate stay well inside VMEM
    # on every generation (v7x: 64 MiB physical).
    return min(512, _round_up((B + 1) // 2, 8))


def encoding_cnn_forward(x_nchw, params, *, block_b=None,
                         compute_dtype=jnp.bfloat16):
    """Pallas implementation of EncodingCNN.forward (default configuration)."""
    (w1, b1), (w2, b2), (w3, b3) = params
    B, C, H, W = x_nchw.shape
    assert (C, H, W) == (1, 28, 28), "specialized to default EncodingCNN config"
    assert w1.shape == (3, 3, 1, _C1)
    assert w2.shape == (3, 3, _C1, _C2)
    assert w3.shape == (3, 3, _C2, _C3)

    tb = _round_up(block_b if block_b is not None else _pick_block_b(B), 8)
    bp = _round_up(B, tb)
    nt = bp // tb

    # Stride-3 / k3 / pad-0 convs only ever read rows/cols 0..26.  Build the
    # fused im2col:  p[(tile, HO, WO, b) row, (dh, dw, kh, kw) lane]
    # where (HO, WO) = conv2 output position (= conv3 tap), (dh, dw) = conv2
    # tap (= conv1 output position inside that receptive field) and (kh, kw) =
    # conv1 tap, so the source pixel is (HO*9 + dh*3 + kh, WO*9 + dw*3 + kw).
    x = x_nchw.astype(jnp.float32)[:, 0, :27, :27]
    if bp != B:
        x = jnp.pad(x, ((0, bp - B), (0, 0), (0, 0)))
    x = x.reshape(nt, tb, 3, 3, 3, 3, 3, 3)      # (tile,b,HO,dh,kh,WO,dw,kw)
    p = x.transpose(0, 2, 5, 1, 3, 6, 4, 7)       # (tile,HO,WO,b,dh,dw,kh,kw)
    p = p.reshape(9 * bp, 81)
    p = jnp.pad(p, ((0, 0), (0, _LANES - 81)))    # lane-dense (…, 128) stream
    p = p.at[:, _ONES_LANE].set(1.0)              # bias-folding lane
    p = p.astype(compute_dtype)

    # Block-diagonal conv1 weight: conv2 tap t reads conv1 channels at lanes
    # [t*32, (t+1)*32), produced from patch lanes [t*9, (t+1)*9).
    w1r = w1.reshape(9, _C1).astype(jnp.float32)
    w1_bd = jnp.zeros((_LANES, _HID), jnp.float32)
    for t in range(9):
        w1_bd = w1_bd.at[t * 9:(t + 1) * 9, t * _C1:(t + 1) * _C1].set(w1r)
    w1_bd = w1_bd.at[_ONES_LANE, :].set(jnp.tile(b1.astype(jnp.float32), 9))
    w1_bd = w1_bd.astype(compute_dtype)

    w2f = w2.reshape(_HID, _C2).astype(compute_dtype)        # (tap*cin, cout)
    b2r = b2.reshape(1, _C2).astype(jnp.float32)
    w3p = jnp.zeros((9, _C2, _OUT_PAD), jnp.float32)
    w3p = w3p.at[:, :, :_C3].set(w3.reshape(9, _C2, _C3).astype(jnp.float32))
    w3p = w3p.astype(compute_dtype)
    b3p = jnp.zeros((1, _OUT_PAD), jnp.float32).at[0, :_C3].set(
        b3.astype(jnp.float32))

    kernel = functools.partial(_fused_encoding_cnn_kernel, tb=tb)

    out = pl.pallas_call(
        kernel,
        out_shape=jax.ShapeDtypeStruct((bp, _OUT_PAD), jnp.float32),
        grid_spec=pltpu.PrefetchScalarGridSpec(
            num_scalar_prefetch=0,
            grid=(nt,),
            in_specs=[
                pl.BlockSpec((9 * tb, _LANES), lambda i: (i, 0)),      # patches
                pl.BlockSpec((_LANES, _HID), lambda i: (0, 0)),        # W1 blkdiag
                pl.BlockSpec((_HID, _C2), lambda i: (0, 0)),           # W2 flat
                pl.BlockSpec((1, _C2), lambda i: (0, 0)),              # b2
                pl.BlockSpec((9, _C2, _OUT_PAD), lambda i: (0, 0, 0)),  # W3 pad
                pl.BlockSpec((1, _OUT_PAD), lambda i: (0, 0)),         # b3 pad
            ],
            out_specs=pl.BlockSpec((tb, _OUT_PAD), lambda i: (i, 0)),
        ),
        compiler_params=pltpu.CompilerParams(
            dimension_semantics=("parallel",),    # batch tiles across TCs (v7x)
            vmem_limit_bytes=48 * 1024 * 1024,    # > v5e/v6e scoped default,
        ),                                        # < v7x 64 MiB physical
    )(p, w1_bd, w2f, b2r, w3p, b3p)
    return out[:B, :_C3]


def init_params(key, channels=(1, 32, 64, 16), k=3):
    """Deterministic synthetic init (torch-like uniform bound 1/sqrt(fan_in))."""
    params = []
    for i in range(len(channels) - 1):
        cin, cout = channels[i], channels[i + 1]
        key, kw_, kb_ = jax.random.split(key, 3)
        bound = 1.0 / (cin * k * k) ** 0.5
        w = jax.random.uniform(kw_, (k, k, cin, cout), jnp.float32, -bound, bound)
        b = jax.random.uniform(kb_, (cout,), jnp.float32, -bound, bound)
        params.append((w, b))
    return params


def reference_forward(x_nchw, params):
    """Pure-JAX reference (lax.conv) for numerical validation."""
    x = x_nchw.astype(jnp.float32)
    n = len(params)
    for i, (w, b) in enumerate(params):
        y = lax.conv_general_dilated(
            x, w, window_strides=(3, 3), padding="VALID",
            dimension_numbers=("NCHW", "HWIO", "NCHW"))
        y = y + b.reshape(1, -1, 1, 1)
        if i < n - 1:
            y = jnp.maximum(y, 0.0)
        x = y
    return x.mean(axis=(2, 3))


if __name__ == "__main__":
    key = jax.random.PRNGKey(0)
    kx, kp = jax.random.split(key)

    # Input consistent with the module defaults: NCHW, 1 channel, 28x28.
    x = jax.random.normal(kx, (2, 1, 28, 28), dtype=jnp.float32)
    params = init_params(kp)

    fwd = jax.jit(encoding_cnn_forward,
                  static_argnames=("block_b", "compute_dtype"))

    ref = jax.block_until_ready(reference_forward(x, params))

    # Default path: bf16 MXU operands, f32 accumulation (native on v6e/v7x).
    out = jax.block_until_ready(fwd(x, params))
    assert out.shape == (2, 16), out.shape
    assert jnp.allclose(out, ref, atol=5e-2, rtol=5e-2), (
        float(jnp.max(jnp.abs(out - ref)))
    )

    # f32 path: tight check that the fused layout reproduces the convolutions.
    out_f32 = jax.block_until_ready(fwd(x, params, compute_dtype=jnp.float32))
    assert jnp.allclose(out_f32, ref, atol=1e-4, rtol=1e-4), (
        float(jnp.max(jnp.abs(out_f32 - ref)))
    )

    print("KERNEL_OK")
</pallas_src>

<mosaic_0001>
module attributes {stable_mosaic.version = 11 : i64} {
  func.func @_fused_encoding_cnn_kernel(%arg0: i32, %arg1: memref<72x128xbf16, #tpu.memory_space<vmem>>, %arg2: memref<128x288xbf16, #tpu.memory_space<vmem>>, %arg3: memref<288x64xbf16, #tpu.memory_space<vmem>>, %arg4: memref<1x64xf32, #tpu.memory_space<vmem>>, %arg5: memref<9x64x128xbf16, #tpu.memory_space<vmem>>, %arg6: memref<1x128xf32, #tpu.memory_space<vmem>>, %arg7: memref<8x128xf32, #tpu.memory_space<vmem>>) attributes {dimension_semantics = [#tpu.dimension_semantics<parallel>], iteration_bounds = array<i64: 1>, scalar_prefetch = 0 : i64, scratch_operands = 0 : i64, tpu.core_type = #tpu.core_type<tc>, window_params = [{transform_indices = @transform_0, window_bounds = array<i64: 72, 128>}, {pipeline_mode = #tpu.pipeline_mode<synchronous>, transform_indices = @transform_1, window_bounds = array<i64: 128, 288>}, {pipeline_mode = #tpu.pipeline_mode<synchronous>, transform_indices = @transform_2, window_bounds = array<i64: 288, 64>}, {pipeline_mode = #tpu.pipeline_mode<synchronous>, transform_indices = @transform_3, window_bounds = array<i64: 1, 64>}, {pipeline_mode = #tpu.pipeline_mode<synchronous>, transform_indices = @transform_4, window_bounds = array<i64: 9, 64, 128>}, {pipeline_mode = #tpu.pipeline_mode<synchronous>, transform_indices = @transform_5, window_bounds = array<i64: 1, 128>}, {transform_indices = @transform_6, window_bounds = array<i64: 8, 128>}]} {
    %c0 = arith.constant 0 : index
    %c0_0 = arith.constant 0 : index
    %0 = vector.load %arg1[%c0, %c0_0] : memref<72x128xbf16, #tpu.memory_space<vmem>>, vector<72x128xbf16>
    %c0_1 = arith.constant 0 : index
    %c0_2 = arith.constant 0 : index
    %1 = vector.load %arg2[%c0_1, %c0_2] : memref<128x288xbf16, #tpu.memory_space<vmem>>, vector<128x288xbf16>
    %cst = arith.constant dense<0.000000e+00> : vector<72x288xf32>
    %2 = tpu.matmul %0, %1, %cst {dimension_numbers = #tpu.dot_dimension_numbers<[1], [0], [0], [1], [0, 0, 1, 1], [], []>} : vector<72x128xbf16>, vector<128x288xbf16>, vector<72x288xf32> -> vector<72x288xf32>
    %cst_3 = arith.constant 0.000000e+00 : f32
    %3 = vector.broadcast %cst_3 : f32 to vector<72x288xf32>
    %4 = arith.maximumf %2, %3 : vector<72x288xf32>
    %5 = arith.truncf %4 : vector<72x288xf32> to vector<72x288xbf16>
    %c0_4 = arith.constant 0 : index
    %c0_5 = arith.constant 0 : index
    %6 = vector.load %arg3[%c0_4, %c0_5] : memref<288x64xbf16, #tpu.memory_space<vmem>>, vector<288x64xbf16>
    %cst_6 = arith.constant dense<0.000000e+00> : vector<72x64xf32>
    %7 = tpu.matmul %5, %6, %cst_6 {dimension_numbers = #tpu.dot_dimension_numbers<[1], [0], [0], [1], [0, 0, 1, 1], [], []>} : vector<72x288xbf16>, vector<288x64xbf16>, vector<72x64xf32> -> vector<72x64xf32>
    %c0_7 = arith.constant 0 : index
    %c0_8 = arith.constant 0 : index
    %8 = vector.load %arg4[%c0_7, %c0_8] : memref<1x64xf32, #tpu.memory_space<vmem>>, vector<1x64xf32>
    %9 = vector.broadcast %8 : vector<1x64xf32> to vector<72x64xf32>
    %10 = arith.addf %7, %9 : vector<72x64xf32>
    %cst_9 = arith.constant 0.000000e+00 : f32
    %11 = vector.broadcast %cst_9 : f32 to vector<72x64xf32>
    %12 = arith.maximumf %10, %11 : vector<72x64xf32>
    %13 = arith.truncf %12 : vector<72x64xf32> to vector<72x64xbf16>
    %c0_10 = arith.constant 0 : index
    %c0_11 = arith.constant 0 : index
    %14 = vector.load %arg6[%c0_10, %c0_11] : memref<1x128xf32, #tpu.memory_space<vmem>>, vector<1x128xf32>
    %15 = vector.shape_cast %14 : vector<1x128xf32> to vector<1x128xf32>
    %16 = vector.broadcast %15 : vector<1x128xf32> to vector<8x128xf32>
    %17 = vector.extract_strided_slice %13 {offsets = [0, 0], sizes = [8, 64], strides = [1, 1]} : vector<72x64xbf16> to vector<8x64xbf16>
    %c0_12 = arith.constant 0 : index
    %c0_13 = arith.constant 0 : index
    %c0_14 = arith.constant 0 : index
    %18 = vector.load %arg5[%c0_12, %c0_13, %c0_14] : memref<9x64x128xbf16, #tpu.memory_space<vmem>>, vector<1x64x128xbf16>
    %19 = vector.shape_cast %18 : vector<1x64x128xbf16> to vector<64x128xbf16>
    %cst_15 = arith.constant dense<0.000000e+00> : vector<8x128xf32>
    %20 = tpu.matmul %17, %19, %cst_15 {dimension_numbers = #tpu.dot_dimension_numbers<[1], [0], [0], [1], [0, 0, 1, 1], [], []>} : vector<8x64xbf16>, vector<64x128xbf16>, vector<8x128xf32> -> vector<8x128xf32>
    %21 = arith.addf %16, %20 : vector<8x128xf32>
    %22 = vector.extract_strided_slice %13 {offsets = [8, 0], sizes = [8, 64], strides = [1, 1]} : vector<72x64xbf16> to vector<8x64xbf16>
    %c1 = arith.constant 1 : index
    %c0_16 = arith.constant 0 : index
    %c0_17 = arith.constant 0 : index
    %23 = vector.load %arg5[%c1, %c0_16, %c0_17] : memref<9x64x128xbf16, #tpu.memory_space<vmem>>, vector<1x64x128xbf16>
    %24 = vector.shape_cast %23 : vector<1x64x128xbf16> to vector<64x128xbf16>
    %cst_18 = arith.constant dense<0.000000e+00> : vector<8x128xf32>
    %25 = tpu.matmul %22, %24, %cst_18 {dimension_numbers = #tpu.dot_dimension_numbers<[1], [0], [0], [1], [0, 0, 1, 1], [], []>} : vector<8x64xbf16>, vector<64x128xbf16>, vector<8x128xf32> -> vector<8x128xf32>
    %26 = arith.addf %21, %25 : vector<8x128xf32>
    %27 = vector.extract_strided_slice %13 {offsets = [16, 0], sizes = [8, 64], strides = [1, 1]} : vector<72x64xbf16> to vector<8x64xbf16>
    %c2 = arith.constant 2 : index
    %c0_19 = arith.constant 0 : index
    %c0_20 = arith.constant 0 : index
    %28 = vector.load %arg5[%c2, %c0_19, %c0_20] : memref<9x64x128xbf16, #tpu.memory_space<vmem>>, vector<1x64x128xbf16>
    %29 = vector.shape_cast %28 : vector<1x64x128xbf16> to vector<64x128xbf16>
    %cst_21 = arith.constant dense<0.000000e+00> : vector<8x128xf32>
    %30 = tpu.matmul %27, %29, %cst_21 {dimension_numbers = #tpu.dot_dimension_numbers<[1], [0], [0], [1], [0, 0, 1, 1], [], []>} : vector<8x64xbf16>, vector<64x128xbf16>, vector<8x128xf32> -> vector<8x128xf32>
    %31 = arith.addf %26, %30 : vector<8x128xf32>
    %32 = vector.extract_strided_slice %13 {offsets = [24, 0], sizes = [8, 64], strides = [1, 1]} : vector<72x64xbf16> to vector<8x64xbf16>
    %c3 = arith.constant 3 : index
    %c0_22 = arith.constant 0 : index
    %c0_23 = arith.constant 0 : index
    %33 = vector.load %arg5[%c3, %c0_22, %c0_23] : memref<9x64x128xbf16, #tpu.memory_space<vmem>>, vector<1x64x128xbf16>
    %34 = vector.shape_cast %33 : vector<1x64x128xbf16> to vector<64x128xbf16>
    %cst_24 = arith.constant dense<0.000000e+00> : vector<8x128xf32>
    %35 = tpu.matmul %32, %34, %cst_24 {dimension_numbers = #tpu.dot_dimension_numbers<[1], [0], [0], [1], [0, 0, 1, 1], [], []>} : vector<8x64xbf16>, vector<64x128xbf16>, vector<8x128xf32> -> vector<8x128xf32>
    %36 = arith.addf %31, %35 : vector<8x128xf32>
    %37 = vector.extract_strided_slice %13 {offsets = [32, 0], sizes = [8, 64], strides = [1, 1]} : vector<72x64xbf16> to vector<8x64xbf16>
    %c4 = arith.constant 4 : index
    %c0_25 = arith.constant 0 : index
    %c0_26 = arith.constant 0 : index
    %38 = vector.load %arg5[%c4, %c0_25, %c0_26] : memref<9x64x128xbf16, #tpu.memory_space<vmem>>, vector<1x64x128xbf16>
    %39 = vector.shape_cast %38 : vector<1x64x128xbf16> to vector<64x128xbf16>
    %cst_27 = arith.constant dense<0.000000e+00> : vector<8x128xf32>
    %40 = tpu.matmul %37, %39, %cst_27 {dimension_numbers = #tpu.dot_dimension_numbers<[1], [0], [0], [1], [0, 0, 1, 1], [], []>} : vector<8x64xbf16>, vector<64x128xbf16>, vector<8x128xf32> -> vector<8x128xf32>
    %41 = arith.addf %36, %40 : vector<8x128xf32>
    %42 = vector.extract_strided_slice %13 {offsets = [40, 0], sizes = [8, 64], strides = [1, 1]} : vector<72x64xbf16> to vector<8x64xbf16>
    %c5 = arith.constant 5 : index
    %c0_28 = arith.constant 0 : index
    %c0_29 = arith.constant 0 : index
    %43 = vector.load %arg5[%c5, %c0_28, %c0_29] : memref<9x64x128xbf16, #tpu.memory_space<vmem>>, vector<1x64x128xbf16>
    %44 = vector.shape_cast %43 : vector<1x64x128xbf16> to vector<64x128xbf16>
    %cst_30 = arith.constant dense<0.000000e+00> : vector<8x128xf32>
    %45 = tpu.matmul %42, %44, %cst_30 {dimension_numbers = #tpu.dot_dimension_numbers<[1], [0], [0], [1], [0, 0, 1, 1], [], []>} : vector<8x64xbf16>, vector<64x128xbf16>, vector<8x128xf32> -> vector<8x128xf32>
    %46 = arith.addf %41, %45 : vector<8x128xf32>
    %47 = vector.extract_strided_slice %13 {offsets = [48, 0], sizes = [8, 64], strides = [1, 1]} : vector<72x64xbf16> to vector<8x64xbf16>
    %c6 = arith.constant 6 : index
    %c0_31 = arith.constant 0 : index
    %c0_32 = arith.constant 0 : index
    %48 = vector.load %arg5[%c6, %c0_31, %c0_32] : memref<9x64x128xbf16, #tpu.memory_space<vmem>>, vector<1x64x128xbf16>
    %49 = vector.shape_cast %48 : vector<1x64x128xbf16> to vector<64x128xbf16>
    %cst_33 = arith.constant dense<0.000000e+00> : vector<8x128xf32>
    %50 = tpu.matmul %47, %49, %cst_33 {dimension_numbers = #tpu.dot_dimension_numbers<[1], [0], [0], [1], [0, 0, 1, 1], [], []>} : vector<8x64xbf16>, vector<64x128xbf16>, vector<8x128xf32> -> vector<8x128xf32>
    %51 = arith.addf %46, %50 : vector<8x128xf32>
    %52 = vector.extract_strided_slice %13 {offsets = [56, 0], sizes = [8, 64], strides = [1, 1]} : vector<72x64xbf16> to vector<8x64xbf16>
    %c7 = arith.constant 7 : index
    %c0_34 = arith.constant 0 : index
    %c0_35 = arith.constant 0 : index
    %53 = vector.load %arg5[%c7, %c0_34, %c0_35] : memref<9x64x128xbf16, #tpu.memory_space<vmem>>, vector<1x64x128xbf16>
    %54 = vector.shape_cast %53 : vector<1x64x128xbf16> to vector<64x128xbf16>
    %cst_36 = arith.constant dense<0.000000e+00> : vector<8x128xf32>
    %55 = tpu.matmul %52, %54, %cst_36 {dimension_numbers = #tpu.dot_dimension_numbers<[1], [0], [0], [1], [0, 0, 1, 1], [], []>} : vector<8x64xbf16>, vector<64x128xbf16>, vector<8x128xf32> -> vector<8x128xf32>
    %56 = arith.addf %51, %55 : vector<8x128xf32>
    %57 = vector.extract_strided_slice %13 {offsets = [64, 0], sizes = [8, 64], strides = [1, 1]} : vector<72x64xbf16> to vector<8x64xbf16>
    %c8 = arith.constant 8 : index
    %c0_37 = arith.constant 0 : index
    %c0_38 = arith.constant 0 : index
    %58 = vector.load %arg5[%c8, %c0_37, %c0_38] : memref<9x64x128xbf16, #tpu.memory_space<vmem>>, vector<1x64x128xbf16>
    %59 = vector.shape_cast %58 : vector<1x64x128xbf16> to vector<64x128xbf16>
    %cst_39 = arith.constant dense<0.000000e+00> : vector<8x128xf32>
    %60 = tpu.matmul %57, %59, %cst_39 {dimension_numbers = #tpu.dot_dimension_numbers<[1], [0], [0], [1], [0, 0, 1, 1], [], []>} : vector<8x64xbf16>, vector<64x128xbf16>, vector<8x128xf32> -> vector<8x128xf32>
    %61 = arith.addf %56, %60 : vector<8x128xf32>
    %c0_40 = arith.constant 0 : index
    %c0_41 = arith.constant 0 : index
    %62 = vector.load %arg7[%c0_40, %c0_41] : memref<8x128xf32, #tpu.memory_space<vmem>>, vector<8x128xf32>
    tpu.vector_store %arg7[%c0_40, %c0_41], %61 {strides = array<i32>} : memref<8x128xf32, #tpu.memory_space<vmem>>, vector<8x128xf32>,
    return
  }
  func.func @transform_0(%arg0: i32) -> (i32, i32) {
    %c0_i32 = arith.constant 0 : i32
    %c0_i32_0 = arith.constant 0 : i32
    return %arg0, %c0_i32 : i32, i32
  }
  func.func @transform_1(%arg0: i32) -> (i32, i32) {
    %c0_i32 = arith.constant 0 : i32
    %c0_i32_0 = arith.constant 0 : i32
    %c0_i32_1 = arith.constant 0 : i32
    return %c0_i32, %c0_i32_0 : i32, i32
  }
  func.func @transform_2(%arg0: i32) -> (i32, i32) {
    %c0_i32 = arith.constant 0 : i32
    %c0_i32_0 = arith.constant 0 : i32
    %c0_i32_1 = arith.constant 0 : i32
    return %c0_i32, %c0_i32_0 : i32, i32
  }
  func.func @transform_3(%arg0: i32) -> (i32, i32) {
    %c0_i32 = arith.constant 0 : i32
    %c0_i32_0 = arith.constant 0 : i32
    %c0_i32_1 = arith.constant 0 : i32
    return %c0_i32, %c0_i32_0 : i32, i32
  }
  func.func @transform_4(%arg0: i32) -> (i32, i32, i32) {
    %c0_i32 = arith.constant 0 : i32
    %c0_i32_0 = arith.constant 0 : i32
    %c0_i32_1 = arith.constant 0 : i32
    %c0_i32_2 = arith.constant 0 : i32
    return %c0_i32, %c0_i32_0, %c0_i32_1 : i32, i32, i32
  }
  func.func @transform_5(%arg0: i32) -> (i32, i32) {
    %c0_i32 = arith.constant 0 : i32
    %c0_i32_0 = arith.constant 0 : i32
    %c0_i32_1 = arith.constant 0 : i32
    return %c0_i32, %c0_i32_0 : i32, i32
  }
  func.func @transform_6(%arg0: i32) -> (i32, i32) {
    %c0_i32 = arith.constant 0 : i32
    %c0_i32_0 = arith.constant 0 : i32
    return %arg0, %c0_i32 : i32, i32
  }
}

</mosaic_0001>

<bundles_post_ra>
// kernel: tile.8
= control target key start
LH: loop header
LB: loop body
LE: loop exit
PB: predicated region body
PF: predicated region fallthrough
CT: control target
= control target key end

     0   :  { %s32_s0 = inlined_call_operand.vmem [shape: f32[32], index: 0, kind: input, shape index: {}]   ;;  %s33_s1 = inlined_call_operand.vmem [shape: bf16[9,32], index: 1, kind: output, shape index: {}]  }
   0x1   :  { %v4_v0 = vld [vmem:[%s32_s0] ss:$0 sm:$0xff] }
   0x2   :  { %v14_v1 = vpack.c.bf16 %v4_v0, %v4_v0 }
   0x4   :  { %15 = vst [vmem:[%s33_s1] sm:$0xff] %v14_v1  }

// kernel: encoding_cnn_forward.1
= control target key start
LH: loop header
LB: loop body
LE: loop exit
PB: predicated region body
PF: predicated region fallthrough
CT: control target
= control target key end

     0   :  { %v2039_v1 = vmov 0   ;;  %v2040_v24 = vmov 0.0   ;;  %vm2041_vm0 = vmmov 0   ;;  %vm567_vm1 = vcmask 261120   ;;  %s2475_s1 = inlined_call_operand.vmem [shape: bf16[128,288], index: 1, kind: input, shape index: {}]   ;;  %s2476_s0 = inlined_call_operand.vmem [shape: bf16[72,128], index: 0, kind: input, shape index: {}]   ;;  %s2477_s2 = inlined_call_operand.vmem [shape: bf16[288,64], index: 2, kind: input, shape index: {}]   ;;  %s2478_s4 = inlined_call_operand.vmem [shape: bf16[9,64,128], index: 4, kind: input, shape index: {}]   ;;  %s2479_s3 = inlined_call_operand.vmem [shape: f32[1,64], index: 3, kind: input, shape index: {}]   ;;  %s2480_s5 = inlined_call_operand.vmem [shape: f32[1,128], index: 5, kind: input, shape index: {}]   ;;  %s2481_s6 = inlined_call_operand.vmem [shape: f32[8,128], index: 6, kind: output, shape index: {}]  }
   0x1   :  { %v1948_v0 = vld [vmem:[%s2475_s1 + $0x4] ss:$12 sps:$4 sm:$0xff]   ;;  %253 = vmatprep.mubr.bf16.mxu1 %v2039_v1  ;;  %v1950_v2 = vld [vmem:[%s2475_s1] ss:$12 sps:$4 sm:$0xff]   ;;  %v1951_v3 = vld [vmem:[%s2475_s1 + $0x1c] ss:$12 sps:$4 sm:$0xff]  }
   0x2   :  { %221 = vmatprep.subr.bf16.mxu1 %v1948_v0  ;;  %v1953_v4 = vld [vmem:[%s2475_s1 + $0x18] ss:$12 sps:$4 sm:$0xff]   ;;  %v1954_v5 = vld [vmem:[%s2475_s1 + $0x34] ss:$12 sps:$4 sm:$0xff]   ;;  %v1956_v6 = vld [vmem:[%s2475_s1 + $0x30] ss:$12 sps:$4 sm:$0xff]  }
   0x3   :  { %222 = vmatpush1.bf16.msra.mxu1 %v1950_v2  ;;  %v1957_v7 = vld [vmem:[%s2475_s1 + $0x4c] ss:$12 sps:$4 sm:$0xff]   ;;  %v1959_v8 = vld [vmem:[%s2475_s1 + $0x48] ss:$12 sps:$4 sm:$0xff]   ;;  %v1960_v9 = vld [vmem:[%s2475_s1 + $0x64] ss:$12 sps:$4 sm:$0xff]  }
   0x4   :  { %223 = vmatprep.subr.bf16.mxu1 %v1951_v3  ;;  %v1962_v10 = vld [vmem:[%s2475_s1 + $0x60] ss:$12 sps:$4 sm:$0xff]   ;;  %v1963_v11 = vld [vmem:[%s2475_s1 + $0x7c] ss:$12 sps:$4 sm:$0xff]   ;;  %v1965_v12 = vld [vmem:[%s2475_s1 + $0x78] ss:$12 sps:$4 sm:$0xff]  }
   0x5   :  { %v1966_v13 = vld [vmem:[%s2475_s1 + $0x94] ss:$12 sps:$4 sm:$0xff]   ;;  %v1968_v14 = vld [vmem:[%s2475_s1 + $0x90] ss:$12 sps:$4 sm:$0xff]   ;;  %v1969_v15 = vld [vmem:[%s2475_s1 + $0xac] ss:$12 sps:$4 sm:$0xff]  }
   0x6   :  { %v2126_v16 = vld [vmem:[%s2477_s2 + $0x40] sm:$0xff]   ;;  %v1971_v17 = vld [vmem:[%s2475_s1 + $0xa8] ss:$12 sps:$4 sm:$0xff]   ;;  %v1991_v27 = vld [vmem:[%s2477_s2 + $0x58] sm:$0xff]   ;;  %vm780_vm2 = vcmask 523264  }
   0x7   :  { %224 = vmatpush1.bf16.msra.mxu1 %v1953_v4  ;;  %v2134_v18 = vld [vmem:[%s2477_s2] sm:$0xff]   ;;  %1630 = vmatprep.subr.bf16.mxu0 %v2126_v16  ;;  %v2140_v19 = vld [vmem:[%s2477_s2 + $0x48] sm:$0xff]   ;;  %v2152_v21 = vld [vmem:[%s2477_s2 + $0x50] sm:$0xff]  }
   0x8   :  { %225 = vmatprep.subr.bf16.mxu1 %v1954_v5  ;;  %1631 = vmatpush3.bf16.msra.mxu0 %v2134_v18  ;;  %v2146_v20 = vld [vmem:[%s2477_s2 + $0x8] sm:$0xff]   ;;  %v1972_v22 = vld [vmem:[%s2476_s0] sm:$0xff]   ;;  %v1990_v25 = vld [vmem:[%s2477_s2 + $0x10] sm:$0xff]  }
   0x9   :  { %1632 = vmatprep.subr.bf16.mxu0 %v2140_v19  ;;  %v1973_v23 = vld [vmem:[%s2475_s1 + $0x8] ss:$12 sps:$4 sm:$0xff]   ;;  %v1974_v26 = vld [vmem:[%s2475_s1 + $0x20] ss:$12 sps:$4 sm:$0xff]   ;;  %v1992_v28 = vld [vmem:[%s2477_s2 + $0x18] sm:$0xff]  }
   0xa   :  { %v1993_v29 = vld [vmem:[%s2477_s2 + $0x60] sm:$0xff]   ;;  %v1975_v30 = vld [vmem:[%s2476_s0 + $0x8] sm:$0xff]   ;;  %v1978_v34 = vld [vmem:[%s2475_s1 + $0x50] ss:$12 sps:$4 sm:$0xff]  }
   0xb   :  { %226 = vmatpush1.bf16.msra.mxu1 %v1956_v6  ;;  %v1976_v31 = vld [vmem:[%s2475_s1 + $0x38] ss:$12 sps:$4 sm:$0xff]   ;;  %v1995_v33 = vld [vmem:[%s2477_s2 + $0x68] sm:$0xff]   ;;  %v1977_v36 = vld [vmem:[%s2476_s0 + $0x10] sm:$0xff]  }
   0xc   :  { %227 = vmatprep.subr.bf16.mxu1 %v1957_v7  ;;  %1633 = vmatpush3.bf16.msra.mxu0 %v2146_v20  ;;  %v1994_v32 = vld [vmem:[%s2477_s2 + $0x20] sm:$0xff]   ;;  %v1996_v35 = vld [vmem:[%s2477_s2 + $0x28] sm:$0xff]   ;;  %v1980_v39 = vld [vmem:[%s2476_s0 + $0x18] sm:$0xff]  }
   0xd   :  { %1634 = vmatprep.subr.bf16.mxu0 %v2152_v21  ;;  %v1979_v37 = vld [vmem:[%s2475_s1 + $0x68] ss:$12 sps:$4 sm:$0xff]   ;;  %v1981_v38 = vld [vmem:[%s2475_s1 + $0x80] ss:$12 sps:$4 sm:$0xff]   ;;  %v1983_v40 = vld [vmem:[%s2475_s1 + $0x98] ss:$12 sps:$4 sm:$0xff]  }
   0xe   :  { %v1984_v41 = vld [vmem:[%s2475_s1 + $0xb0] ss:$12 sps:$4 sm:$0xff]   ;;  %v1982_v42 = vld [vmem:[%s2476_s0 + $0x20] ss:$0 sps:$4 sm:$0xff]  }
   0xf   :  { %228 = vmatpush1.bf16.msra.mxu1 %v1959_v8  ;;  %v1997_v43 = vld [vmem:[%s2477_s2 + $0x70] sm:$0xff]   ;;  %v1999_v45 = vld [vmem:[%s2477_s2 + $0x78] sm:$0xff]  }
  0x10   :  { %229 = vmatprep.subr.bf16.mxu1 %v1960_v9  ;;  %1635 = vmatpush3.bf16.msra.mxu0 %v1990_v25  ;;  %v1998_v44 = vld [vmem:[%s2477_s2 + $0x30] sm:$0xff]   ;;  %v2000_v46 = vld [vmem:[%s2477_s2 + $0x38] sm:$0xff]  }
  0x11   :  { %1636 = vmatprep.subr.bf16.mxu0 %v1991_v27 }
  0x13   :  { %230 = vmatpush1.bf16.msra.mxu1 %v1962_v10 }
  0x14   :  { %231 = vmatprep.subr.bf16.mxu1 %v1963_v11  ;;  %1637 = vmatpush3.bf16.msra.mxu0 %v1992_v28 }
  0x15   :  { %1638 = vmatprep.subr.bf16.mxu0 %v1993_v29 }
  0x17   :  { %232 = vmatpush1.bf16.msra.mxu1 %v1965_v12 }
  0x18   :  { %233 = vmatprep.subr.bf16.mxu1 %v1966_v13  ;;  %1639 = vmatpush3.bf16.msra.mxu0 %v1994_v32  ;;  %v2001_v13 = vld [vmem:[%s2477_s2 + $0x80] sm:$0xff]  }
  0x19   :  { %1640 = vmatprep.subr.bf16.mxu0 %v1995_v33 }
  0x1b   :  { %234 = vmatpush1.bf16.msra.mxu1 %v1968_v14 }
  0x1c   :  { %235 = vmatprep.subr.bf16.mxu1 %v1969_v15  ;;  %1641 = vmatpush3.bf16.msra.mxu0 %v1996_v35 }
  0x1d   :  { %1642 = vmatprep.subr.bf16.mxu0 %v1997_v43 }
  0x1f   :  { %236 = vmatpush1.bf16.msra.mxu1 %v1971_v17  ;;  %v2002_v17 = vld [vmem:[%s2477_s2 + $0x88] sm:$0xff]  }
  0x20   :  { %1728 = vmatprep.subr.bf16.mxu1 %v2040_v24  ;;  %1643 = vmatpush3.bf16.msra.mxu0 %v1998_v44 }
  0x21   :  { %1644 = vmatprep.subr.bf16.mxu0 %v1999_v45 }
  0x22   :  { %254 = vmatmul.mubr.bf16.vlgmr.msra.gmra.mrb[0].mxu1 %v1972_v22 }
  0x23   :  { %1729 = vmatpush3.bf16.msra.mxu1 %v1973_v23  ;;  %263 = vmatprep.mubr.bf16.mxu1 %v2039_v1 }
  0x24   :  { %1730 = vmatprep.subr.bf16.mxu1 %v2040_v24  ;;  %1645 = vmatpush3.bf16.msra.mxu0 %v2000_v46 }
  0x25   :  { %1788 = vmatprep.subr.bf16.mxu0 %v2040_v24 }
  0x27   :  { %1731 = vmatpush3.bf16.msra.mxu1 %v1974_v26 }
  0x28   :  { %1732 = vmatprep.subr.bf16.mxu1 %v2040_v24 }
  0x2a   :  { %264 = vmatmul.mubr.bf16.gmra.mrb[4].mxu1 %v1975_v30 }
  0x2b   :  { %1733 = vmatpush3.bf16.msra.mxu1 %v1976_v31  ;;  %273 = vmatprep.mubr.bf16.mxu1 %v2039_v1 }
  0x2c   :  { %1734 = vmatprep.subr.bf16.mxu1 %v2040_v24 }
  0x2f   :  { %1735 = vmatpush3.bf16.msra.mxu1 %v1978_v34 }
  0x30   :  { %1736 = vmatprep.subr.bf16.mxu1 %v2040_v24 }
  0x32   :  { %274 = vmatmul.mubr.bf16.gmra.mrb[8].mxu1 %v1977_v36 }
  0x33   :  { %1737 = vmatpush3.bf16.msra.mxu1 %v1979_v37  ;;  %283 = vmatprep.mubr.bf16.mxu1 %v2039_v1 }
  0x34   :  { %1738 = vmatprep.subr.bf16.mxu1 %v2040_v24 }
  0x37   :  { %1739 = vmatpush3.bf16.msra.mxu1 %v1981_v38 }
  0x38   :  { %1740 = vmatprep.subr.bf16.mxu1 %v2040_v24 }
  0x3a   :  { %284 = vmatmul.mubr.bf16.gmra.mrb[12].mxu1 %v1980_v39 }
  0x3b   :  { %293 = vmatprep.mubr.bf16.mxu1 %v2039_v1  ;;  %1741 = vmatpush3.bf16.msra.mxu1 %v1983_v40 }
  0x3c   :  { %1742 = vmatprep.subr.bf16.mxu1 %v2040_v24 }
  0x3f   :  { %1743 = vmatpush3.bf16.msra.mxu1 %v1984_v41 }
  0x40   :  { %1896 = vmatprep.subr.bf16.mxu1 %v2126_v16 }
  0x42   :  { %294 = vmatmul.mubr.bf16.gmra.mrb[16].mxu1 %v1982_v42 }
  0x43   :  { %1744 = vmatprep.mubr.msk.bf16.mxu1 %vm2041_vm0, %v2040_v24 }
  0x4a   :  { %1745 = vmatmul.mubr.bf16.vlgmr.msra.gmra.mrb[20].mxu1 %v1972_v22 }
  0x4b   :  { %1748 = vmatprep.mubr.msk.bf16.mxu1 %vm2041_vm0, %v2040_v24  ;;  %1904 = vmatpush3.bf16.msra.mxu1 %v2134_v18 }
  0x4c   :  { %1897 = vmatprep.subr.bf16.mxu1 %v2140_v19 }
  0x4f   :  { %1905 = vmatpush3.bf16.msra.mxu1 %v2146_v20 }
  0x50   :  { %1898 = vmatprep.subr.bf16.mxu1 %v2152_v21 }
  0x52   :  { %1749 = vmatmul.mubr.bf16.gmra.mrb[24].mxu1 %v1975_v30 }
  0x53   :  { %1752 = vmatprep.mubr.msk.bf16.mxu1 %vm2041_vm0, %v2040_v24  ;;  %1906 = vmatpush3.bf16.msra.mxu1 %v1990_v25 }
  0x54   :  { %1899 = vmatprep.subr.bf16.mxu1 %v1991_v27 }
  0x57   :  { %1907 = vmatpush3.bf16.msra.mxu1 %v1992_v28 }
  0x58   :  { %1900 = vmatprep.subr.bf16.mxu1 %v1993_v29 }
  0x5a   :  { %1753 = vmatmul.mubr.bf16.gmra.mrb[28].mxu1 %v1977_v36 }
  0x5b   :  { %1756 = vmatprep.mubr.msk.bf16.mxu1 %vm2041_vm0, %v2040_v24  ;;  %1908 = vmatpush3.bf16.msra.mxu1 %v1994_v32 }
  0x5c   :  { %1901 = vmatprep.subr.bf16.mxu1 %v1995_v33 }
  0x5f   :  { %1909 = vmatpush3.bf16.msra.mxu1 %v1996_v35 }
  0x60   :  { %1902 = vmatprep.subr.bf16.mxu1 %v1997_v43 }
  0x62   :  { %1757 = vmatmul.mubr.bf16.gmra.mrb[32].mxu1 %v1980_v39 }
  0x63   :  { %1760 = vmatprep.mubr.msk.bf16.mxu1 %vm2041_vm0, %v2040_v24  ;;  %1910 = vmatpush3.bf16.msra.mxu1 %v1998_v44 }
  0x64   :  { %1903 = vmatprep.subr.bf16.mxu1 %v1999_v45 }
  0x67   :  { %1911 = vmatpush3.bf16.msra.mxu1 %v2000_v46 }
  0x68   :  { %1764 = vmatprep.subr.bf16.mxu1 %v2040_v24 }
  0x6a   :  { %1761 = vmatmul.mubr.bf16.gmra.mrb[36].mxu1 %v1982_v42 }
  0xf5   :  { %v255_v47 = vpop.f32.mrb[0].mxu1 }
  0xf6   :  { %v257_v48 = vpop.f32.mrb[1].mxu1  ;;  %v374_v50 = vmax.f32 %v255_v47, 0.0 }
  0xf7   :  { %v259_v49 = vpop.f32.mrb[2].mxu1  ;;  %v375_v53 = vmax.f32 %v257_v48, 0.0 }
  0xf8   :  { %v377_v51 = vmax.f32 %v259_v49, 0.0  ;;  %v261_v52 = vpop.f32.mrb[3].mxu1 }
  0xf9   :  { %v378_v54 = vmax.f32 %v261_v52, 0.0 }
  0xfa   :  { %v401_v55 = vpack.c.bf16 %v377_v51, %v374_v50 }
  0xfb   :  { %v402_v56 = vpack.c.bf16 %v378_v54, %v375_v53 }
  0xfd   :  { %v265_v57 = vpop.f32.mrb[4].mxu1  ;;  %615 = vmatprep.mubr.bf16.mxu0 %v402_v56 }
  0xfe   :  { %v267_v58 = vpop.f32.mrb[5].mxu1  ;;  %616 = vmatmul.mubr.bf16.vlgmr.msra.gmra.mrb[0].mxu0 %v401_v55  ;;  %v380_v60 = vmax.f32 %v265_v57, 0.0 }
  0xff   :  { %v269_v59 = vpop.f32.mrb[6].mxu1  ;;  %v381_v63 = vmax.f32 %v267_v58, 0.0 }
 0x100   :  { %v383_v61 = vmax.f32 %v269_v59, 0.0  ;;  %v271_v62 = vpop.f32.mrb[7].mxu1 }
 0x101   :  { %v384_v0 = vmax.f32 %v271_v62, 0.0 }
 0x102   :  { %v404_v1 = vpack.c.bf16 %v383_v61, %v380_v60 }
 0x103   :  { %v405_v2 = vpack.c.bf16 %v384_v0, %v381_v63 }
 0x105   :  { %v275_v3 = vpop.f32.mrb[8].mxu1  ;;  %623 = vmatprep.mubr.bf16.mxu0 %v405_v2 }
 0x106   :  { %v277_v4 = vpop.f32.mrb[9].mxu1  ;;  %624 = vmatmul.mubr.bf16.gmra.mrb[4].mxu0 %v404_v1  ;;  %v386_v6 = vmax.f32 %v275_v3, 0.0 }
 0x107   :  { %v279_v5 = vpop.f32.mrb[10].mxu1  ;;  %1796 = vmatprep.mubr.msk.bf16.mxu0 %vm2041_vm0, %v2040_v24  ;;  %v387_v9 = vmax.f32 %v277_v4, 0.0  ;;  %v2003_v4 = vld [vmem:[%s2478_s4] sm:$0xff]  }
 0x108   :  { %v389_v7 = vmax.f32 %v279_v5, 0.0  ;;  %v281_v8 = vpop.f32.mrb[11].mxu1  ;;  %1789 = vmatpush3.bf16.msra.mxu0 %v2003_v4  ;;  %v2004_v5 = vld [vmem:[%s2478_s4 + $0x8] sm:$0xff]  }
 0x109   :  { %v390_v10 = vmax.f32 %v281_v8, 0.0  ;;  %1790 = vmatprep.subr.bf16.mxu0 %v2040_v24 }
 0x10a   :  { %v407_v11 = vpack.c.bf16 %v389_v7, %v386_v6  ;;  %v2005_v6 = vld [vmem:[%s2478_s4 + $0x10] sm:$0xff]   ;;  %v2006_v7 = vld [vmem:[%s2478_s4 + $0x18] sm:$0xff]  }
 0x10b   :  { %v408_v12 = vpack.c.bf16 %v390_v10, %v387_v9 }
 0x10c   :  { %1791 = vmatpush3.bf16.msra.mxu0 %v2004_v5 }
 0x10d   :  { %v285_v14 = vpop.f32.mrb[12].mxu1  ;;  %631 = vmatprep.mubr.bf16.mxu1 %v408_v12  ;;  %1792 = vmatprep.subr.bf16.mxu0 %v2040_v24 }
 0x10e   :  { %v287_v15 = vpop.f32.mrb[13].mxu1  ;;  %632 = vmatmul.mubr.bf16.vlgmr.msra.gmra.mrb[40].mxu1 %v407_v11  ;;  %v392_v18 = vmax.f32 %v285_v14, 0.0 }
 0x10f   :  { %1765 = vmatpush3.bf16.msra.mxu1 %v2001_v13  ;;  %v289_v16 = vpop.f32.mrb[14].mxu1  ;;  %v393_v21 = vmax.f32 %v287_v15, 0.0 }
 0x110   :  { %v395_v19 = vmax.f32 %v289_v16, 0.0  ;;  %v291_v20 = vpop.f32.mrb[15].mxu1  ;;  %1766 = vmatprep.subr.bf16.mxu1 %v2040_v24  ;;  %1793 = vmatpush3.bf16.msra.mxu0 %v2005_v6 }
 0x111   :  { %v396_v22 = vmax.f32 %v291_v20, 0.0  ;;  %1794 = vmatprep.subr.bf16.mxu0 %v2040_v24 }
 0x112   :  { %v410_v23 = vpack.c.bf16 %v395_v19, %v392_v18 }
 0x113   :  { %v411_v25 = vpack.c.bf16 %v396_v22, %v393_v21  ;;  %1767 = vmatpush3.bf16.msra.mxu1 %v2002_v17 }
 0x114   :  { %1795 = vmatpush3.bf16.msra.mxu0 %v2006_v7 }
 0x115   :  { %v295_v26 = vpop.f32.mrb[16].mxu1  ;;  %639 = vmatprep.mubr.bf16.mxu1 %v411_v25  ;;  %1800 = vmatprep.subr.bf16.mxu0 %v2040_v24 }
 0x116   :  { %v297_v27 = vpop.f32.mrb[17].mxu1  ;;  %640 = vmatmul.mubr.bf16.gmra.mrb[44].mxu1 %v410_v23  ;;  %v398_v30 = vmax.f32 %v295_v26, 0.0  ;;  %v1483_v26 = vld [vmem:[%s2479_s3] ss:$0 sm:$0xff] }
 0x117   :  { %v399_v28 = vmax.f32 %v297_v27, 0.0  ;;  %v299_v29 = vpop.f32.mrb[18].mxu1 }
 0x118   :  { %v300_v31 = vpop.f32.mrb[19].mxu1  ;;  %v413_v33 = vpack.c.bf16 %v398_v30, %v398_v30 }
 0x119   :  { %v414_v32 = vpack.c.bf16 %v399_v28, %v399_v28 }
 0x11b   :  { %647 = vmatprep.mubr.bf16.mxu1 %v414_v32 }
 0x11d   :  { %v336_v34 = vpop.f32.mrb[20].mxu1 }
 0x11e   :  { %v376_v35 = vmax.f32 %v336_v34, 0.0  ;;  %v1746_v36 = vpop.f32.mrb[21].mxu1  ;;  %648 = vmatmul.mubr.bf16.gmra.mrb[48].mxu1 %v413_v33 }
 0x11f   :  { %v339_v37 = vpop.f32.mrb[22].mxu1  ;;  %1768 = vmatprep.mubr.msk.bf16.mxu1 %vm2041_vm0, %v2040_v24 }
 0x120   :  { %v379_v38 = vmax.f32 %v339_v37, 0.0  ;;  %v1747_v39 = vpop.f32.mrb[23].mxu1 }
 0x122   :  { %v403_v40 = vpack.c.bf16 %v379_v38, %v376_v35 }
 0x125   :  { %v344_v41 = vpop.f32.mrb[24].mxu1 }
 0x126   :  { %1769 = vmatmul.mubr.msk.bf16.vlgmr.msra.gmra.mrb[52].mxu1 %vm567_vm1, %v403_v40  ;;  %v382_v42 = vmax.f32 %v344_v41, 0.0  ;;  %v1750_v43 = vpop.f32.mrb[25].mxu1 }
 0x127   :  { %v347_v44 = vpop.f32.mrb[26].mxu1  ;;  %1772 = vmatprep.mubr.msk.bf16.mxu1 %vm2041_vm0, %v2040_v24 }
 0x128   :  { %v385_v45 = vmax.f32 %v347_v44, 0.0  ;;  %v1751_v46 = vpop.f32.mrb[27].mxu1 }
 0x12a   :  { %v406_v47 = vpack.c.bf16 %v385_v45, %v382_v42 }
 0x12d   :  { %v352_v48 = vpop.f32.mrb[28].mxu1 }
 0x12e   :  { %1773 = vmatmul.mubr.msk.bf16.gmra.mrb[56].mxu1 %vm567_vm1, %v406_v47  ;;  %v388_v49 = vmax.f32 %v352_v48, 0.0  ;;  %v1754_v50 = vpop.f32.mrb[29].mxu1 }
 0x12f   :  { %v355_v51 = vpop.f32.mrb[30].mxu1  ;;  %1776 = vmatprep.mubr.msk.bf16.mxu1 %vm2041_vm0, %v2040_v24 }
 0x130   :  { %v391_v52 = vmax.f32 %v355_v51, 0.0  ;;  %v1755_v53 = vpop.f32.mrb[31].mxu1 }
 0x132   :  { %v409_v54 = vpack.c.bf16 %v391_v52, %v388_v49 }
 0x135   :  { %v360_v55 = vpop.f32.mrb[32].mxu1 }
 0x136   :  { %1777 = vmatmul.mubr.msk.bf16.gmra.mrb[60].mxu1 %vm567_vm1, %v409_v54  ;;  %v394_v56 = vmax.f32 %v360_v55, 0.0  ;;  %v1758_v57 = vpop.f32.mrb[33].mxu1  ;;  %v2007_v54 = vld [vmem:[%s2478_s4 + $0x20] sm:$0xff]  }
 0x137   :  { %v363_v58 = vpop.f32.mrb[34].mxu1  ;;  %1780 = vmatprep.mubr.msk.bf16.mxu1 %vm2041_vm0, %v2040_v24 }
 0x138   :  { %v397_v59 = vmax.f32 %v363_v58, 0.0  ;;  %v1759_v60 = vpop.f32.mrb[35].mxu1 }
 0x13a   :  { %v412_v61 = vpack.c.bf16 %v397_v59, %v394_v56 }
 0x13d   :  { %v368_v62 = vpop.f32.mrb[36].mxu1 }
 0x13e   :  { %1781 = vmatmul.mubr.msk.bf16.gmra.mrb[64].mxu1 %vm567_vm1, %v412_v61  ;;  %v400_v63 = vmax.f32 %v368_v62, 0.0  ;;  %v1762_v0 = vpop.f32.mrb[37].mxu1  ;;  %v2008_v62 = vld [vmem:[%s2478_s4 + $0x28] sm:$0xff]  }
 0x13f   :  { %1784 = vmatprep.mubr.msk.bf16.mxu1 %vm2041_vm0, %v2040_v24  ;;  %v371_v1 = vpop.f32.mrb[38].mxu1 }
 0x140   :  { %v1763_v2 = vpop.f32.mrb[39].mxu1  ;;  %v415_v3 = vpack.c.bf16 %v400_v63, %v400_v63 }
 0x146   :  { %1785 = vmatmul.mubr.msk.bf16.gmra.mrb[68].mxu1 %vm567_vm1, %v415_v3  ;;  %v2009_v3 = vld [vmem:[%s2478_s4 + $0x30] sm:$0xff]  }
 0x1d1   :  { %v1646_v8 = vpop.f32.mrb[0].mxu0 }
 0x1d2   :  { %v1647_v9 = vpop.f32.mrb[1].mxu0 }
 0x1d3   :  { %v1648_v10 = vadd.f32 %v1647_v9, %v1646_v8  ;;  %v1649_v11 = vpop.f32.mrb[2].mxu0  ;;  %v2010_v9 = vld [vmem:[%s2478_s4 + $0x38] sm:$0xff]  }
 0x1d4   :  { %v1650_v12 = vpop.f32.mrb[3].mxu0 }
 0x1d5   :  { %v1651_v13 = vadd.f32 %v1650_v12, %v1649_v11  ;;  %v618_v44 = vadd.f32 %v1648_v10, %v1483_v26 }
 0x1d7   :  { %v621_v48 = vadd.f32 %v1651_v13, %v1483_v26 }
 0x1d9   :  { %v1652_v14 = vpop.f32.mrb[4].mxu0 }
 0x1da   :  { %v1653_v15 = vpop.f32.mrb[5].mxu0 }
 0x1db   :  { %v1654_v16 = vadd.f32 %v1653_v15, %v1652_v14  ;;  %v1655_v17 = vpop.f32.mrb[6].mxu0  ;;  %v2011_v14 = vld [vmem:[%s2478_s4 + $0x40] sm:$0xff]  }
 0x1dc   :  { %v1656_v18 = vpop.f32.mrb[7].mxu0 }
 0x1dd   :  { %v1657_v19 = vadd.f32 %v1656_v18, %v1655_v17  ;;  %v626_v56 = vadd.f32 %v1654_v16, %v1483_v26 }
 0x1df   :  { %v629_v60 = vadd.f32 %v1657_v19, %v1483_v26 }
 0x1e1   :  { %v1658_v20 = vpop.f32.mrb[40].mxu1 }
 0x1e2   :  { %v1659_v21 = vpop.f32.mrb[41].mxu1 }
 0x1e3   :  { %v1660_v22 = vadd.f32 %v1659_v21, %v1658_v20  ;;  %v1661_v23 = vpop.f32.mrb[42].mxu1  ;;  %v2012_v21 = vld [vmem:[%s2478_s4 + $0x48] sm:$0xff]  }
 0x1e4   :  { %v1662_v25 = vpop.f32.mrb[43].mxu1 }
 0x1e5   :  { %v1663_v27 = vadd.f32 %v1662_v25, %v1661_v23  ;;  %v634_v28 = vadd.f32 %v1660_v22, %v1483_v26 }
 0x1e7   :  { %v637_v29 = vadd.f32 %v1663_v27, %v1483_v26  ;;  %v2013_v27 = vld [vmem:[%s2478_s4 + $0x50] sm:$0xff]  }
 0x1e9   :  { %v1664_v30 = vpop.f32.mrb[44].mxu1 }
 0x1ea   :  { %v1665_v31 = vpop.f32.mrb[45].mxu1 }
 0x1eb   :  { %v1666_v32 = vadd.f32 %v1665_v31, %v1664_v30  ;;  %v1667_v33 = vpop.f32.mrb[46].mxu1 }
 0x1ec   :  { %v1668_v34 = vpop.f32.mrb[47].mxu1 }
 0x1ed   :  { %v1669_v35 = vadd.f32 %v1668_v34, %v1667_v33  ;;  %v642_v36 = vadd.f32 %v1666_v32, %v1483_v26  ;;  %v2014_v32 = vld [vmem:[%s2478_s4 + $0x58] sm:$0xff]  }
 0x1ef   :  { %v2300_v37 = vadd.f32 %v1669_v35, %v1483_v26  ;;  %v2015_v35 = vld [vmem:[%s2478_s4 + $0x60] sm:$0xff]  }
 0x1f1   :  { %v1670_v38 = vpop.f32.mrb[48].mxu1 }
 0x1f2   :  { %v1671_v39 = vpop.f32.mrb[49].mxu1 }
 0x1f3   :  { %v1672_v40 = vadd.f32 %v1671_v39, %v1670_v38  ;;  %v1673_v41 = vpop.f32.mrb[50].mxu1  ;;  %v2018_v38 = vld [vmem:[%s2478_s4 + $0x78] sm:$0xff]   ;;  %v2019_v39 = vld [vmem:[%s2478_s4 + $0x80] sm:$0xff]  }
 0x1f4   :  { %v1674_v42 = vpop.f32.mrb[51].mxu1  ;;  %v2020_v41 = vld [vmem:[%s2478_s4 + $0x88] sm:$0xff]  }
 0x1f5   :  { %v2302_v43 = vadd.f32 %v1672_v40, %v1483_v26  ;;  %v2021_v42 = vld [vmem:[%s2478_s4 + $0x90] sm:$0xff]  }
 0x1f9   :  { %v689_v45 = vpop.f32.mrb[52].mxu1 }
 0x1fa   :  { %v690_v46 = vadd.f32 %v689_v45, %v618_v44  ;;  %v1770_v47 = vpop.f32.mrb[53].mxu1  ;;  %v2023_v44 = vld [vmem:[%s2478_s4 + $0xa0] sm:$0xff]   ;;  %v2024_v45 = vld [vmem:[%s2478_s4 + $0xa8] sm:$0xff]  }
 0x1fb   :  { %v692_v49 = vpop.f32.mrb[54].mxu1  ;;  %v2026_v47 = vld [vmem:[%s2478_s4 + $0xb8] sm:$0xff]  }
 0x1fc   :  { %v693_v50 = vadd.f32 %v692_v49, %v621_v48  ;;  %v1771_v51 = vpop.f32.mrb[55].mxu1  ;;  %v727_v52 = vmax.f32 %v690_v46, 0.0  ;;  %v2025_v46 = vld [vmem:[%s2478_s4 + $0xb0] sm:$0xff]   ;;  %v2027_v48 = vld [vmem:[%s2478_s4 + $0xc0] sm:$0xff]  }
 0x1fd   :  { %v2029_v51 = vld [vmem:[%s2478_s4 + $0xd0] sm:$0xff]  }
 0x1fe   :  { %v728_v53 = vmax.f32 %v693_v50, 0.0  ;;  %v2028_v50 = vld [vmem:[%s2478_s4 + $0xc8] sm:$0xff]  }
 0x200   :  { %v736_v55 = vpack.c.bf16 %v728_v53, %v727_v52  ;;  %v2030_v52 = vld [vmem:[%s2478_s4 + $0xd8] sm:$0xff]   ;;  %v2031_v53 = vld [vmem:[%s2478_s4 + $0xe0] sm:$0xff]  }
 0x201   :  { %v697_v57 = vpop.f32.mrb[56].mxu1 }
 0x202   :  { %v698_v58 = vadd.f32 %v697_v57, %v626_v56  ;;  %v1774_v59 = vpop.f32.mrb[57].mxu1  ;;  %1797 = vmatmul.mubr.msk.bf16.vlgmr.msra.gmra.mrb[8].mxu0 %vm780_vm2, %v736_v55  ;;  %v835_v15 = vrot.slane %v736_v55, 4  ;;  %v2033_v55 = vld [vmem:[%s2478_s4 + $0xf0] sm:$0xff]   ;;  %v2034_v56 = vld [vmem:[%s2478_s4 + $0xf8] sm:$0xff]   ;;  %v2035_v57 = vld [vmem:[%s2478_s4 + $0x100] sm:$0xff]  }
 0x203   :  { %1801 = vmatpush3.bf16.msra.mxu0 %v2007_v54  ;;  %v700_v61 = vpop.f32.mrb[58].mxu1  ;;  %1808 = vmatprep.mubr.msk.bf16.mxu0 %vm2041_vm0, %v2040_v24  ;;  %v2032_v54 = vld [vmem:[%s2478_s4 + $0xe8] sm:$0xff]  }
 0x204   :  { %v701_v63 = vadd.f32 %v700_v61, %v629_v60  ;;  %1802 = vmatprep.subr.bf16.mxu0 %v2040_v24  ;;  %v1775_v0 = vpop.f32.mrb[59].mxu1  ;;  %v729_v1 = vmax.f32 %v698_v58, 0.0  ;;  %v2036_v59 = vld [vmem:[%s2478_s4 + $0x108] sm:$0xff]   ;;  %v2037_v60 = vld [vmem:[%s2478_s4 + $0x110] sm:$0xff]   ;;  %v2038_v61 = vld [vmem:[%s2478_s4 + $0x118] sm:$0xff]  }
 0x205   :  { %v1507_v0 = vld [vmem:[%s2480_s5] ss:$0 sm:$0xff] }
 0x206   :  { %v730_v2 = vmax.f32 %v701_v63, 0.0 }
 0x207   :  { %1803 = vmatpush3.bf16.msra.mxu0 %v2008_v62 }
 0x208   :  { %v737_v4 = vpack.c.bf16 %v730_v2, %v729_v1  ;;  %1804 = vmatprep.subr.bf16.mxu0 %v2040_v24 }
 0x209   :  { %v705_v5 = vpop.f32.mrb[60].mxu1 }
 0x20a   :  { %v706_v6 = vadd.f32 %v705_v5, %v634_v28  ;;  %v1778_v7 = vpop.f32.mrb[61].mxu1  ;;  %v991_v40 = vrot.slane %v737_v4, 4 }
 0x20b   :  { %1805 = vmatpush3.bf16.msra.mxu0 %v2009_v3  ;;  %v708_v8 = vpop.f32.mrb[62].mxu1 }
 0x20c   :  { %v709_v10 = vadd.f32 %v708_v8, %v637_v29  ;;  %1806 = vmatprep.subr.bf16.mxu0 %v2040_v24  ;;  %v1779_v11 = vpop.f32.mrb[63].mxu1  ;;  %v731_v12 = vmax.f32 %v706_v6, 0.0 }
 0x20e   :  { %v732_v13 = vmax.f32 %v709_v10, 0.0 }
 0x20f   :  { %1807 = vmatpush3.bf16.msra.mxu0 %v2010_v9 }
 0x210   :  { %v2325_v16 = vpack.c.bf16 %v732_v13, %v731_v12  ;;  %1812 = vmatprep.subr.bf16.mxu0 %v2040_v24 }
 0x211   :  { %v713_v17 = vpop.f32.mrb[64].mxu1 }
 0x212   :  { %v714_v18 = vadd.f32 %v713_v17, %v642_v36  ;;  %1809 = vmatmul.mubr.msk.bf16.vlgmr.msra.gmra.mrb[8].mxu0 %vm780_vm2, %v835_v15  ;;  %v1782_v19 = vpop.f32.mrb[65].mxu1  ;;  %v2016_v36 = vld [vmem:[%s2478_s4 + $0x68] sm:$0xff]   ;;  %v1147_v49 = vrot.slane %v2325_v16, 4 }
 0x213   :  { %1813 = vmatpush3.bf16.msra.mxu0 %v2011_v14  ;;  %v716_v20 = vpop.f32.mrb[66].mxu1  ;;  %1820 = vmatprep.mubr.msk.bf16.mxu0 %vm2041_vm0, %v2040_v24 }
 0x214   :  { %v717_v22 = vadd.f32 %v716_v20, %v2300_v37  ;;  %1814 = vmatprep.subr.bf16.mxu0 %v2040_v24  ;;  %v1783_v23 = vpop.f32.mrb[67].mxu1  ;;  %v733_v25 = vmax.f32 %v714_v18, 0.0  ;;  %v2017_v37 = vld [vmem:[%s2478_s4 + $0x70] sm:$0xff]  }
 0x216   :  { %v734_v26 = vmax.f32 %v717_v22, 0.0 }
 0x217   :  { %1815 = vmatpush3.bf16.msra.mxu0 %v2012_v21 }
 0x218   :  { %v2339_v28 = vpack.c.bf16 %v734_v26, %v733_v25  ;;  %1816 = vmatprep.subr.bf16.mxu0 %v2040_v24 }
 0x219   :  { %v721_v29 = vpop.f32.mrb[68].mxu1 }
 0x21a   :  { %v2343_v30 = vadd.f32 %v721_v29, %v2302_v43  ;;  %v1786_v31 = vpop.f32.mrb[69].mxu1  ;;  %v2022_v43 = vld [vmem:[%s2478_s4 + $0x98] sm:$0xff]   ;;  %v1303_v58 = vrot.slane %v2339_v28, 4 }
 0x21b   :  { %1817 = vmatpush3.bf16.msra.mxu0 %v2013_v27  ;;  %v724_v33 = vpop.f32.mrb[70].mxu1 }
 0x21c   :  { %1818 = vmatprep.subr.bf16.mxu0 %v2040_v24  ;;  %v1787_v34 = vpop.f32.mrb[71].mxu1  ;;  %v735_v62 = vmax.f32 %v2343_v30, 0.0 }
 0x21e   :  { %v740_v63 = vpack.c.bf16 %v735_v62, %v735_v62 }
 0x21f   :  { %1819 = vmatpush3.bf16.msra.mxu0 %v2014_v32 }
 0x220   :  { %1824 = vmatprep.subr.bf16.mxu0 %v2040_v24 }
 0x222   :  { %1821 = vmatmul.mubr.msk.bf16.vlgmr.msra.gmra.mrb[8].mxu0 %vm780_vm2, %v737_v4 }
 0x223   :  { %1825 = vmatpush3.bf16.msra.mxu0 %v2015_v35  ;;  %1832 = vmatprep.mubr.msk.bf16.mxu0 %vm2041_vm0, %v2040_v24 }
 0x224   :  { %1826 = vmatprep.subr.bf16.mxu0 %v2040_v24 }
 0x227   :  { %1827 = vmatpush3.bf16.msra.mxu0 %v2016_v36 }
 0x228   :  { %1828 = vmatprep.subr.bf16.mxu0 %v2040_v24 }
 0x22b   :  { %1829 = vmatpush3.bf16.msra.mxu0 %v2017_v37 }
 0x22c   :  { %1830 = vmatprep.subr.bf16.mxu0 %v2040_v24 }
 0x22f   :  { %1831 = vmatpush3.bf16.msra.mxu0 %v2018_v38 }
 0x230   :  { %1836 = vmatprep.subr.bf16.mxu0 %v2040_v24 }
 0x232   :  { %1833 = vmatmul.mubr.msk.bf16.vlgmr.msra.gmra.mrb[8].mxu0 %vm780_vm2, %v991_v40 }
 0x233   :  { %1837 = vmatpush3.bf16.msra.mxu0 %v2019_v39  ;;  %1844 = vmatprep.mubr.msk.bf16.mxu0 %vm2041_vm0, %v2040_v24 }
 0x234   :  { %1838 = vmatprep.subr.bf16.mxu0 %v2040_v24 }
 0x237   :  { %1839 = vmatpush3.bf16.msra.mxu0 %v2020_v41 }
 0x238   :  { %1840 = vmatprep.subr.bf16.mxu0 %v2040_v24 }
 0x23b   :  { %1841 = vmatpush3.bf16.msra.mxu0 %v2021_v42 }
 0x23c   :  { %1842 = vmatprep.subr.bf16.mxu0 %v2040_v24 }
 0x23f   :  { %1843 = vmatpush3.bf16.msra.mxu0 %v2022_v43 }
 0x240   :  { %1848 = vmatprep.subr.bf16.mxu0 %v2040_v24 }
 0x242   :  { %1845 = vmatmul.mubr.msk.bf16.vlgmr.msra.gmra.mrb[8].mxu0 %vm780_vm2, %v2325_v16 }
 0x243   :  { %1849 = vmatpush3.bf16.msra.mxu0 %v2023_v44  ;;  %1856 = vmatprep.mubr.msk.bf16.mxu0 %vm2041_vm0, %v2040_v24 }
 0x244   :  { %1850 = vmatprep.subr.bf16.mxu0 %v2040_v24 }
 0x247   :  { %1851 = vmatpush3.bf16.msra.mxu0 %v2024_v45 }
 0x248   :  { %1852 = vmatprep.subr.bf16.mxu0 %v2040_v24 }
 0x24b   :  { %1853 = vmatpush3.bf16.msra.mxu0 %v2025_v46 }
 0x24c   :  { %1854 = vmatprep.subr.bf16.mxu0 %v2040_v24 }
 0x24f   :  { %1855 = vmatpush3.bf16.msra.mxu0 %v2026_v47 }
 0x250   :  { %1860 = vmatprep.subr.bf16.mxu0 %v2040_v24 }
 0x252   :  { %1857 = vmatmul.mubr.msk.bf16.vlgmr.msra.gmra.mrb[8].mxu0 %vm780_vm2, %v1147_v49 }
 0x253   :  { %1861 = vmatpush3.bf16.msra.mxu0 %v2027_v48  ;;  %1868 = vmatprep.mubr.msk.bf16.mxu0 %vm2041_vm0, %v2040_v24 }
 0x254   :  { %1862 = vmatprep.subr.bf16.mxu0 %v2040_v24 }
 0x257   :  { %1863 = vmatpush3.bf16.msra.mxu0 %v2028_v50 }
 0x258   :  { %1864 = vmatprep.subr.bf16.mxu0 %v2040_v24 }
 0x25b   :  { %1865 = vmatpush3.bf16.msra.mxu0 %v2029_v51 }
 0x25c   :  { %1866 = vmatprep.subr.bf16.mxu0 %v2040_v24 }
 0x25f   :  { %1867 = vmatpush3.bf16.msra.mxu0 %v2030_v52 }
 0x260   :  { %1872 = vmatprep.subr.bf16.mxu0 %v2040_v24 }
 0x262   :  { %1869 = vmatmul.mubr.msk.bf16.vlgmr.msra.gmra.mrb[8].mxu0 %vm780_vm2, %v2339_v28 }
 0x263   :  { %1873 = vmatpush3.bf16.msra.mxu0 %v2031_v53  ;;  %1880 = vmatprep.mubr.msk.bf16.mxu0 %vm2041_vm0, %v2040_v24 }
 0x264   :  { %1874 = vmatprep.subr.bf16.mxu0 %v2040_v24 }
 0x267   :  { %1875 = vmatpush3.bf16.msra.mxu0 %v2032_v54 }
 0x268   :  { %1876 = vmatprep.subr.bf16.mxu0 %v2040_v24 }
 0x26b   :  { %1877 = vmatpush3.bf16.msra.mxu0 %v2033_v55 }
 0x26c   :  { %1878 = vmatprep.subr.bf16.mxu0 %v2040_v24 }
 0x26f   :  { %1879 = vmatpush3.bf16.msra.mxu0 %v2034_v56 }
 0x270   :  { %1884 = vmatprep.subr.bf16.mxu0 %v2040_v24 }
 0x272   :  { %1881 = vmatmul.mubr.msk.bf16.vlgmr.msra.gmra.mrb[8].mxu0 %vm780_vm2, %v1303_v58 }
 0x273   :  { %1885 = vmatpush3.bf16.msra.mxu0 %v2035_v57  ;;  %1892 = vmatprep.mubr.msk.bf16.mxu0 %vm2041_vm0, %v2040_v24 }
 0x274   :  { %1886 = vmatprep.subr.bf16.mxu0 %v2040_v24 }
 0x277   :  { %1887 = vmatpush3.bf16.msra.mxu0 %v2036_v59 }
 0x278   :  { %1888 = vmatprep.subr.bf16.mxu0 %v2040_v24 }
 0x27b   :  { %1889 = vmatpush3.bf16.msra.mxu0 %v2037_v60 }
 0x27c   :  { %1890 = vmatprep.subr.bf16.mxu0 %v2040_v24 }
 0x27f   :  { %1891 = vmatpush3.bf16.msra.mxu0 %v2038_v61 }
 0x282   :  { %1893 = vmatmul.mubr.msk.bf16.vlgmr.msra.gmra.mrb[8].mxu0 %vm780_vm2, %v740_v63 }
 0x355   :  { %v1442_v1 = vpop.f32.mrb[8].mxu0 }
 0x356   :  { %v1912_v2 = vadd.f32 %v1507_v0, %v1442_v1  ;;  %v1894_v3 = vpop.f32.mrb[9].mxu0 }
 0x357   :  { %v1445_v4 = vpop.f32.mrb[10].mxu0 }
 0x358   :  { %1449 = vst [vmem:[%s2481_s6] sm:$0xff] %v1912_v2  ;;  %v1895_v5 = vpop.f32.mrb[11].mxu0 }

</bundles_post_ra>
